<compile_context>
chip_gen: v6e
topology: v6e:2x2x1
jax: 0.10.0
libtpu: 0.0.40
codegen_flags: <defaults>
</compile_context>

<pallas_src>
import functools
import math

import jax
import jax.numpy as jnp
from jax.experimental import pallas as pl
from jax.experimental.pallas import tpu as pltpu


_SQRT_2_OVER_PI = math.sqrt(2.0 / math.pi)
# 0.5*h*(1 + tanh(u)) == h * sigmoid(2u),  u = sqrt(2/pi) * (h + 0.044715*h^3)
_C1 = 2.0 * _SQRT_2_OVER_PI
_C2 = 2.0 * _SQRT_2_OVER_PI * 0.044715


def _round_up(x, m):
    return ((x + m - 1) // m) * m


def _gelu_tanh(h):
    # sigmoid form of the tanh-approx GELU; logistic goes to the EUP slot.
    return h * jax.nn.sigmoid(_C1 * h + _C2 * h * (h * h))


# ----------------------------------------------------------------------------
# Kernels
# ----------------------------------------------------------------------------
def _mlp_kernel_resident(x_ref, wfc_ref, bfc_ref, wproj_ref, bproj_ref, o_ref,
                         *, gelu_dtype):
    # Full weights resident in VMEM; 1-D grid over row tiles; no accumulator.
    h = jnp.dot(x_ref[...], wfc_ref[...], preferred_element_type=jnp.float32)
    h = (h + bfc_ref[...].astype(jnp.float32)).astype(gelu_dtype)
    g = _gelu_tanh(h)
    out = jnp.dot(g.astype(wproj_ref.dtype), wproj_ref[...],
                  preferred_element_type=jnp.float32)
    o_ref[...] = (out + bproj_ref[...].astype(jnp.float32)).astype(o_ref.dtype)


def _mlp_kernel_tiled(x_ref, wfc_ref, bfc_ref, wproj_ref, bproj_ref, o_ref,
                      acc_ref, *, gelu_dtype):
    # H-tiled reduction: grid = (M//tm, H//th), k is the reduction axis.
    k = pl.program_id(1)

    @pl.when(k == 0)
    def _init():
        acc_ref[...] = jnp.zeros_like(acc_ref)

    h = jnp.dot(x_ref[...], wfc_ref[...], preferred_element_type=jnp.float32)
    h = (h + bfc_ref[...].astype(jnp.float32)).astype(gelu_dtype)
    g = _gelu_tanh(h)
    acc_ref[...] += jnp.dot(g.astype(wproj_ref.dtype), wproj_ref[...],
                            preferred_element_type=jnp.float32)

    @pl.when(k == pl.num_programs(1) - 1)
    def _finalize():
        o_ref[...] = (acc_ref[...]
                      + bproj_ref[...].astype(jnp.float32)).astype(o_ref.dtype)


# ----------------------------------------------------------------------------
# Sizing helpers
# ----------------------------------------------------------------------------
def _vmem_budget_bytes():
    """Per-generation usable VMEM budget (leaves headroom for compiler scratch)."""
    cap = None
    try:
        info = pltpu.get_tpu_info()
        cap = getattr(info, "vmem_capacity_bytes", None)
    except Exception:
        cap = None
    if not cap:
        try:
            kind = jax.devices()[0].device_kind.lower()
        except Exception:
            kind = ""
        cap = (64 << 20) if "v7" in kind else (128 << 20)
    return int(min(cap - (8 << 20), int(cap * 0.8)))


def _pick_gelu_dtype(x_dtype):
    """bf16 GELU on chips with bf16 VPU/EUP (v6e/v7x); f32 otherwise."""
    if jnp.dtype(x_dtype) != jnp.dtype(jnp.bfloat16):
        return jnp.float32
    try:
        kind = jax.devices()[0].device_kind.lower()
    except Exception:
        return jnp.float32
    if ("v6" in kind) or ("v7" in kind):
        return jnp.bfloat16
    return jnp.float32


def _resident_vmem_bytes(tm, C, H, x_bytes, w_bytes, gelu_bytes):
    return (2 * tm * C * x_bytes                      # x tile (double-buffered)
            + 2 * tm * C * x_bytes                    # out tile
            + 2 * (C * H + H + H * C + C) * w_bytes   # weights (double-buffered)
            + tm * H * 4 + tm * H * gelu_bytes)       # h (f32) + gelu temporaries


def _tiled_vmem_bytes(tm, th, C, x_bytes, w_bytes, gelu_bytes):
    return (2 * tm * C * x_bytes                      # x tile
            + 2 * tm * C * x_bytes                    # out tile
            + 2 * (C * th + th) * w_bytes             # W_fc + b_fc chunk
            + 2 * (th * C + C) * w_bytes              # W_proj + b_proj chunk
            + tm * C * 4                              # f32 accumulator scratch
            + tm * th * 4 + tm * th * gelu_bytes)     # h + gelu temporaries


def _pick_hidden_tile(H, tm, C, budget, x_bytes, w_bytes, gelu_bytes):
    """Largest multiple of 128 dividing H whose tiled working set fits VMEM."""
    candidates = [d for d in range(H, 0, -128) if d % 128 == 0 and H % d == 0]
    if not candidates:
        return H
    for d in candidates:
        if _tiled_vmem_bytes(tm, d, C, x_bytes, w_bytes, gelu_bytes) <= budget:
            return d
    return candidates[-1]


# ----------------------------------------------------------------------------
# Wrapper
# ----------------------------------------------------------------------------
def mlp_pallas(x, w_fc, b_fc, w_proj, b_proj, *, tm=512, th=None):
    """x: (B, T, C); w_fc: (C, 4C); b_fc: (4C,); w_proj: (4C, C); b_proj: (C,).

    Returns (B, T, C).  If `th` is given, the H-tiled reduction path is forced
    (mainly for testing); otherwise full weight residency is used when the
    weights fit the per-generation VMEM budget.
    """
    B, T, C = x.shape
    H = w_fc.shape[1]
    assert w_fc.shape == (C, H) and w_proj.shape == (H, C)
    M = B * T

    x_bytes = jnp.dtype(x.dtype).itemsize
    w_bytes = jnp.dtype(w_fc.dtype).itemsize
    row_align = 16 if x_bytes < 4 else 8
    budget = _vmem_budget_bytes()
    gelu_dtype = _pick_gelu_dtype(x.dtype)
    gelu_bytes = jnp.dtype(gelu_dtype).itemsize

    # Row tiling: cap at M; prefer >= 2 row tiles so both v7x TensorCores work.
    n_tiles = max(1, pl.cdiv(M, tm))
    if n_tiles == 1 and M > row_align:
        n_tiles = 2
    tm = _round_up(pl.cdiv(M, n_tiles), row_align)

    force_tiled = th is not None

    # Prefer full weight residency (weights DMA'd exactly once); shrink tm if
    # that is what it takes to fit the budget.
    resident_tm = None
    if not force_tiled:
        cand = tm
        while True:
            if _resident_vmem_bytes(cand, C, H, x_bytes, w_bytes,
                                    gelu_bytes) <= budget:
                resident_tm = cand
                break
            if cand <= row_align:
                break
            cand = _round_up(max(row_align, cand // 2), row_align)

    b_fc2 = b_fc.reshape(1, H)
    b_proj2 = b_proj.reshape(1, C)

    if resident_tm is not None:
        tm = resident_tm
        M_pad = _round_up(M, tm)
        x2 = x.reshape(M, C)
        if M_pad > M:
            x2 = jnp.pad(x2, ((0, M_pad - M), (0, 0)))
        cost = pl.CostEstimate(
            flops=4 * M_pad * C * H,
            transcendentals=M_pad * H,
            bytes_accessed=(2 * M_pad * C * x_bytes            # x read + out write
                            + (C * H + H + H * C + C) * w_bytes))  # weights once
        out = pl.pallas_call(
            functools.partial(_mlp_kernel_resident, gelu_dtype=gelu_dtype),
            out_shape=jax.ShapeDtypeStruct((M_pad, C), x.dtype),
            grid_spec=pltpu.PrefetchScalarGridSpec(
                num_scalar_prefetch=0,
                grid=(M_pad // tm,),
                in_specs=[
                    pl.BlockSpec((tm, C), lambda i: (i, 0)),   # x row tile
                    pl.BlockSpec((C, H), lambda i: (0, 0)),    # W_fc (resident)
                    pl.BlockSpec((1, H), lambda i: (0, 0)),    # b_fc (resident)
                    pl.BlockSpec((H, C), lambda i: (0, 0)),    # W_proj (resident)
                    pl.BlockSpec((1, C), lambda i: (0, 0)),    # b_proj (resident)
                ],
                out_specs=pl.BlockSpec((tm, C), lambda i: (i, 0)),
            ),
            compiler_params=pltpu.CompilerParams(
                dimension_semantics=("parallel",),
                vmem_limit_bytes=budget),
            cost_estimate=cost,
        )(x2, w_fc, b_fc2, w_proj, b_proj2)
        return out[:M].reshape(B, T, C)

    # Fallback: H-tiled reduction (weights too big for VMEM residency, or forced).
    if th is None:
        th = _pick_hidden_tile(H, tm, C, budget, x_bytes, w_bytes, gelu_bytes)
    assert H % th == 0, f"hidden tile {th} must divide H={H}"
    while (_tiled_vmem_bytes(tm, th, C, x_bytes, w_bytes, gelu_bytes) > budget
           and tm > row_align):
        tm = _round_up(max(row_align, tm // 2), row_align)
    M_pad = _round_up(M, tm)
    x2 = x.reshape(M, C)
    if M_pad > M:
        x2 = jnp.pad(x2, ((0, M_pad - M), (0, 0)))
    n_row_tiles = M_pad // tm
    cost = pl.CostEstimate(
        flops=4 * M_pad * C * H,
        transcendentals=M_pad * H,
        bytes_accessed=(2 * M_pad * C * x_bytes
                        + n_row_tiles * (C * H + H + H * C + C) * w_bytes))
    out = pl.pallas_call(
        functools.partial(_mlp_kernel_tiled, gelu_dtype=gelu_dtype),
        out_shape=jax.ShapeDtypeStruct((M_pad, C), x.dtype),
        grid_spec=pltpu.PrefetchScalarGridSpec(
            num_scalar_prefetch=0,
            grid=(n_row_tiles, H // th),
            in_specs=[
                pl.BlockSpec((tm, C), lambda i, k: (i, 0)),   # x row tile
                pl.BlockSpec((C, th), lambda i, k: (0, k)),   # W_fc H-chunk
                pl.BlockSpec((1, th), lambda i, k: (0, k)),   # b_fc H-chunk
                pl.BlockSpec((th, C), lambda i, k: (k, 0)),   # W_proj H-chunk
                pl.BlockSpec((1, C), lambda i, k: (0, 0)),    # b_proj
            ],
            out_specs=pl.BlockSpec((tm, C), lambda i, k: (i, 0)),
            scratch_shapes=[pltpu.VMEM((tm, C), jnp.float32)],
        ),
        compiler_params=pltpu.CompilerParams(
            dimension_semantics=("parallel", "arbitrary"),
            vmem_limit_bytes=budget),
        cost_estimate=cost,
    )(x2, w_fc, b_fc2, w_proj, b_proj2)
    return out[:M].reshape(B, T, C)


# ----------------------------------------------------------------------------
# Reference + tests
# ----------------------------------------------------------------------------
def _reference(x, w_fc, b_fc, w_proj, b_proj):
    h = jnp.dot(x.astype(jnp.float32), w_fc.astype(jnp.float32)) + b_fc.astype(jnp.float32)
    g = 0.5 * h * (1.0 + jnp.tanh(_SQRT_2_OVER_PI * (h + 0.044715 * h ** 3)))
    return jnp.dot(g, w_proj.astype(jnp.float32)) + b_proj.astype(jnp.float32)


def _make_params(key, C, H, dtype):
    k1, k2, k3, k4 = jax.random.split(key, 4)
    bound_fc = 1.0 / math.sqrt(C)
    bound_pr = 1.0 / math.sqrt(H)
    w_fc = jax.random.uniform(k1, (C, H), jnp.float32, -bound_fc, bound_fc).astype(dtype)
    b_fc = jax.random.uniform(k2, (H,), jnp.float32, -bound_fc, bound_fc).astype(dtype)
    w_proj = jax.random.uniform(k3, (H, C), jnp.float32, -bound_pr, bound_pr).astype(dtype)
    b_proj = jax.random.uniform(k4, (C,), jnp.float32, -bound_pr, bound_pr).astype(dtype)
    return w_fc, b_fc, w_proj, b_proj


if __name__ == "__main__":
    key = jax.random.PRNGKey(0)
    kx1, kp1, kx2, kp2 = jax.random.split(key, 4)

    # 1) Small GPT-2-like config (weight-resident path): batch=2, seq=8, n_embd=128.
    B, T, C = 2, 8, 128
    H = 4 * C
    x = jax.random.normal(kx1, (B, T, C), dtype=jnp.float32)
    w_fc, b_fc, w_proj, b_proj = _make_params(kp1, C, H, jnp.float32)

    out = jax.block_until_ready(mlp_pallas(x, w_fc, b_fc, w_proj, b_proj))
    ref = _reference(x, w_fc, b_fc, w_proj, b_proj)
    assert out.shape == (B, T, C)
    assert jnp.allclose(out, ref, atol=5e-4, rtol=5e-4), "f32 mismatch vs reference"

    # 2) Forced H-tiled fallback (th=512): exercises padding, multiple row
    #    tiles and the k-reduction accumulator path.
    B2, T2, C2 = 3, 100, 256
    H2 = 4 * C2
    x2 = jax.random.normal(kx2, (B2, T2, C2), dtype=jnp.float32)
    w_fc2, b_fc2, w_proj2, b_proj2 = _make_params(kp2, C2, H2, jnp.float32)

    out2 = jax.block_until_ready(
        mlp_pallas(x2, w_fc2, b_fc2, w_proj2, b_proj2, th=512))
    ref2 = _reference(x2, w_fc2, b_fc2, w_proj2, b_proj2)
    assert out2.shape == (B2, T2, C2)
    assert jnp.allclose(out2, ref2, atol=1e-3, rtol=1e-3), "tiled mismatch vs reference"

    # 3) bf16 operands (native MXU path, f32 accumulation; bf16 GELU on v6e/v7x).
    xb = x.astype(jnp.bfloat16)
    wfb, bfb, wpb, bpb = (a.astype(jnp.bfloat16) for a in (w_fc, b_fc, w_proj, b_proj))
    outb = jax.block_until_ready(mlp_pallas(xb, wfb, bfb, wpb, bpb))
    assert outb.dtype == jnp.bfloat16
    assert jnp.allclose(outb.astype(jnp.float32), ref, atol=1e-1, rtol=1e-1), \
        "bf16 mismatch vs reference"

    print("KERNEL_OK")
</pallas_src>

<mosaic_0001>
module attributes {stable_mosaic.version = 11 : i64} {
  func.func @_mlp_kernel_resident(%arg0: i32, %arg1: memref<8x128xf32, #tpu.memory_space<vmem>>, %arg2: memref<128x512xf32, #tpu.memory_space<vmem>>, %arg3: memref<1x512xf32, #tpu.memory_space<vmem>>, %arg4: memref<512x128xf32, #tpu.memory_space<vmem>>, %arg5: memref<1x128xf32, #tpu.memory_space<vmem>>, %arg6: memref<8x128xf32, #tpu.memory_space<vmem>>) attributes {dimension_semantics = [#tpu.dimension_semantics<parallel>], iteration_bounds = array<i64: 2>, scalar_prefetch = 0 : i64, scratch_operands = 0 : i64, tpu.core_type = #tpu.core_type<tc>, window_params = [{transform_indices = @transform_0, window_bounds = array<i64: 8, 128>}, {pipeline_mode = #tpu.pipeline_mode<synchronous>, transform_indices = @transform_1, window_bounds = array<i64: 128, 512>}, {pipeline_mode = #tpu.pipeline_mode<synchronous>, transform_indices = @transform_2, window_bounds = array<i64: 1, 512>}, {pipeline_mode = #tpu.pipeline_mode<synchronous>, transform_indices = @transform_3, window_bounds = array<i64: 512, 128>}, {pipeline_mode = #tpu.pipeline_mode<synchronous>, transform_indices = @transform_4, window_bounds = array<i64: 1, 128>}, {transform_indices = @transform_5, window_bounds = array<i64: 8, 128>}]} {
    %c0 = arith.constant 0 : index
    %c0_0 = arith.constant 0 : index
    %0 = vector.load %arg1[%c0, %c0_0] : memref<8x128xf32, #tpu.memory_space<vmem>>, vector<8x128xf32>
    %c0_1 = arith.constant 0 : index
    %c0_2 = arith.constant 0 : index
    %1 = vector.load %arg2[%c0_1, %c0_2] : memref<128x512xf32, #tpu.memory_space<vmem>>, vector<128x512xf32>
    %cst = arith.constant dense<0.000000e+00> : vector<8x512xf32>
    %2 = tpu.matmul %0, %1, %cst {dimension_numbers = #tpu.dot_dimension_numbers<[1], [0], [0], [1], [0, 0, 1, 1], [], []>} : vector<8x128xf32>, vector<128x512xf32>, vector<8x512xf32> -> vector<8x512xf32>
    %c0_3 = arith.constant 0 : index
    %c0_4 = arith.constant 0 : index
    %3 = vector.load %arg3[%c0_3, %c0_4] : memref<1x512xf32, #tpu.memory_space<vmem>>, vector<1x512xf32>
    %4 = vector.broadcast %3 : vector<1x512xf32> to vector<8x512xf32>
    %5 = arith.addf %2, %4 : vector<8x512xf32>
    %cst_5 = arith.constant 1.59576917 : f32
    %6 = vector.broadcast %cst_5 : f32 to vector<8x512xf32>
    %7 = arith.mulf %6, %5 : vector<8x512xf32>
    %cst_6 = arith.constant 0.0713548139 : f32
    %8 = vector.broadcast %cst_6 : f32 to vector<8x512xf32>
    %9 = arith.mulf %8, %5 : vector<8x512xf32>
    %10 = arith.mulf %5, %5 : vector<8x512xf32>
    %11 = arith.mulf %9, %10 : vector<8x512xf32>
    %12 = arith.addf %7, %11 : vector<8x512xf32>
    %13 = arith.negf %12 : vector<8x512xf32>
    %14 = math.exp %13 : vector<8x512xf32>
    %cst_7 = arith.constant 1.000000e+00 : f32
    %15 = vector.broadcast %cst_7 : f32 to vector<8x512xf32>
    %16 = arith.addf %15, %14 : vector<8x512xf32>
    %17 = arith.divf %15, %16 : vector<8x512xf32>
    %18 = arith.mulf %5, %17 : vector<8x512xf32>
    %c0_8 = arith.constant 0 : index
    %c0_9 = arith.constant 0 : index
    %19 = vector.load %arg4[%c0_8, %c0_9] : memref<512x128xf32, #tpu.memory_space<vmem>>, vector<512x128xf32>
    %cst_10 = arith.constant dense<0.000000e+00> : vector<8x128xf32>
    %20 = tpu.matmul %18, %19, %cst_10 {dimension_numbers = #tpu.dot_dimension_numbers<[1], [0], [0], [1], [0, 0, 1, 1], [], []>} : vector<8x512xf32>, vector<512x128xf32>, vector<8x128xf32> -> vector<8x128xf32>
    %c0_11 = arith.constant 0 : index
    %c0_12 = arith.constant 0 : index
    %21 = vector.load %arg5[%c0_11, %c0_12] : memref<1x128xf32, #tpu.memory_space<vmem>>, vector<1x128xf32>
    %22 = vector.broadcast %21 : vector<1x128xf32> to vector<8x128xf32>
    %23 = arith.addf %20, %22 : vector<8x128xf32>
    %c0_13 = arith.constant 0 : index
    %c0_14 = arith.constant 0 : index
    %24 = vector.load %arg6[%c0_13, %c0_14] : memref<8x128xf32, #tpu.memory_space<vmem>>, vector<8x128xf32>
    tpu.vector_store %arg6[%c0_13, %c0_14], %23 {strides = array<i32>} : memref<8x128xf32, #tpu.memory_space<vmem>>, vector<8x128xf32>,
    return
  }
  func.func @transform_0(%arg0: i32) -> (i32, i32) {
    %c0_i32 = arith.constant 0 : i32
    %c0_i32_0 = arith.constant 0 : i32
    return %arg0, %c0_i32 : i32, i32
  }
  func.func @transform_1(%arg0: i32) -> (i32, i32) {
    %c0_i32 = arith.constant 0 : i32
    %c0_i32_0 = arith.constant 0 : i32
    %c0_i32_1 = arith.constant 0 : i32
    return %c0_i32, %c0_i32_0 : i32, i32
  }
  func.func @transform_2(%arg0: i32) -> (i32, i32) {
    %c0_i32 = arith.constant 0 : i32
    %c0_i32_0 = arith.constant 0 : i32
    %c0_i32_1 = arith.constant 0 : i32
    return %c0_i32, %c0_i32_0 : i32, i32
  }
  func.func @transform_3(%arg0: i32) -> (i32, i32) {
    %c0_i32 = arith.constant 0 : i32
    %c0_i32_0 = arith.constant 0 : i32
    %c0_i32_1 = arith.constant 0 : i32
    return %c0_i32, %c0_i32_0 : i32, i32
  }
  func.func @transform_4(%arg0: i32) -> (i32, i32) {
    %c0_i32 = arith.constant 0 : i32
    %c0_i32_0 = arith.constant 0 : i32
    %c0_i32_1 = arith.constant 0 : i32
    return %c0_i32, %c0_i32_0 : i32, i32
  }
  func.func @transform_5(%arg0: i32) -> (i32, i32) {
    %c0_i32 = arith.constant 0 : i32
    %c0_i32_0 = arith.constant 0 : i32
    return %arg0, %c0_i32 : i32, i32
  }
}

</mosaic_0001>

<bundles_post_ra>
// kernel: tpu_custom_call.1
= control target key start
LH: loop header
LB: loop body
LE: loop exit
PB: predicated region body
PF: predicated region fallthrough
CT: control target
= control target key end

     0   :  { %10 = vsyncpa [#allocation3], 0  ;;  %s1482_s0 = inlined_call_operand.hbm [shape: f32[16,128], index: 0, kind: input, shape index: {}]   ;;  %s1483_s1 = inlined_call_operand.hbm [shape: f32[128,512], index: 1, kind: input, shape index: {}]   ;;  %s1484_s2 = inlined_call_operand.hbm [shape: f32[1,512], index: 2, kind: input, shape index: {}]   ;;  %s1485_s3 = inlined_call_operand.hbm [shape: f32[512,128], index: 3, kind: input, shape index: {}]   ;;  %s1486_s4 = inlined_call_operand.vmem [shape: f32[1,128], index: 4, kind: input, shape index: {}]   ;;  %s1487_s5 = inlined_call_operand.hbm [shape: f32[16,128], index: 5, kind: output, shape index: {}]  }
   0x1   :  { %12 = vsyncpa [#allocation3 + $0x1], 0 }
   0x2   :  { %13 = vsyncpa [#allocation6], 0 }
   0x3   :  { %14 = vsyncpa [#allocation9], 0 }
   0x4   :  { %15 = vsyncpa [#allocation4], 0 }
   0x5   :  { %17 = vsyncpa [#allocation4 + $0x1], 0  ;;  %s1295_s18 = smov 0   ;;  %s1297_s19 = smov 0  }
   0x6   :  { %s1299_s20 = smov 0   ;;  %s1301_s21 = smov 0  }
   0x7 LB: > { %s1316_s22 = sadd.s32 4294967295, %s1253_s21   ;;  %s884_s23 = sadd.s32 4294967294, %s1253_s21   ;;  %s1253_s21 = sphi %s1301_s21, %s1511_s21   ;;  %s1249_s20 = sphi %s1299_s20, %s1510_s20   ;;  %s1245_s19 = sphi %s1297_s19, %s1509_s19   ;;  %s1241_s18 = sphi %s1295_s18, %s1508_s18  }
   0x8   : > { %p43_p0 = scmp.ne.s32.totalorder %s1245_s19, %s1241_s18  ;;  %p1488_p1 = scmp.eq.s32.totalorder %s1316_s22, 0 }
   0x9   : > { %p157_p3 = scmp.eq.s32.totalorder %s884_s23, 1  ;;  %p885_p5 = scmp.ge.s32.totalorder %s1253_s21, 1 }
   0xa   : > { %p1325_p4 = por %p1488_p1, %p43_p0  ;;  %p164_p7 = scmp.lt.s32.totalorder %s1253_s21, 3 }
   0xb   : > { %p1330_p6 = por %p157_p3, %p43_p0  ;;  %s1255_s27 = smov [#allocation5]  }
   0xc   : > { %s1492_s24 = scalar_select %p1325_p4, 1, 0 }
   0xd   : > { %s1493_s25 = scalar_select %p1330_p6, 1, 0 }
   0xe   : > { %p1335_p8 = pnand %p885_p5, %p164_p7  ;;  %s176_s28 = sshll.u32 %s1255_s27, 4  ;;  %s177_s28 = int_to_ptr.vmem [resolvable:$true] %s176_s28 }
   0xf   : > { %s1256_s30 = smov [#allocation7]   ;;  %s1257_s7 = smov [#allocation8]  }
  0x10   : > { %s1494_s26 = scalar_select %p1335_p8, 1, 0 }
  0x11   : > { %p993_p9 = pneg %p1335_p8  ;;  %s190_s6 = sshll.u32 %s1256_s30, 4  ;;  %s191_s6 = int_to_ptr.vmem [resolvable:$true] %s190_s6 }
  0x12   : > { %s200_s8 = sshll.u32 %s1257_s7, 4  ;;  %s1086_s9 = scalar_lea.vmem %s177_s28, 8192  ;;  %s201_s8 = int_to_ptr.vmem [resolvable:$true] %s200_s8 }
  0x13   : > { %p1344_p11 = pnand %p993_p9, %p1488_p1  ;;  %p1087_p13 = scmp.ne.s32.totalorder %s177_s28, %s1086_s9 }
  0x14   : > { %p1094_p5 = scmp.lt.s32.totalorder %s177_s28, %s177_s28  ;;  %p1095_p7 = scmp.lt.s32.totalorder %s1086_s9, %s1086_s9 }
  0x15   : > { %p1077_p12 = pneg %p1344_p11 }
  0x16   : > { %p1096_p9 = por %p1095_p7, %p1094_p5 }
  0x17   : > { %p1089_p0 = pnand %p1087_p13, %p1077_p12 }
  0x19   : > { %p1090_p3 = pneg %p1089_p0 }
  0x1b   : > { %p1097_p10 = pnand %p1096_p9, %p1090_p3 }
  0x1d   : > { %1100 = shalt.err (!%p1097_p10)
}
  0x1e   : > { %s1258_s10 = smov 512   ;;  %s1259_s11 = smov 32  }
  0x1f   : > { %996 = dma.hbm_to_vmem [thread:$0]  (!%p1344_p11), %s1483_s1, 8192, %s177_s28, [#allocation6], %s1258_s10, %s1258_s10, %s1259_s11  }
  0x20   : > { %s1112_s14 = scalar_lea.vmem %s191_s6, 64  ;;  %p1120_p2 = scmp.lt.s32.totalorder %s191_s6, %s191_s6 }
  0x21   : > { %p1113_p1 = scmp.ne.s32.totalorder %s191_s6, %s1112_s14  ;;  %p1121_p6 = scmp.lt.s32.totalorder %s1112_s14, %s1112_s14 }
  0x23   : > { %p1115_p13 = pnand %p1113_p1, %p1077_p12  ;;  %p1122_p5 = por %p1121_p6, %p1120_p2 }
  0x25   : > { %p1116_p0 = pneg %p1115_p13 }
  0x27   : > { %p1123_p3 = pnand %p1122_p5, %p1116_p0 }
  0x29   : > { %1126 = shalt.err (!%p1123_p3)
}
  0x2a   : > { %999 = dma.hbm_to_vmem [thread:$0]  (!%p1344_p11), %s1484_s2, 64, %s191_s6, [#allocation6]  }
  0x2b   : > { %s1138_s17 = scalar_lea.vmem %s201_s8, 8192  ;;  %p1146_p9 = scmp.lt.s32.totalorder %s201_s8, %s201_s8 }
  0x2c   : > { %p1139_p10 = scmp.ne.s32.totalorder %s201_s8, %s1138_s17  ;;  %p1147_p13 = scmp.lt.s32.totalorder %s1138_s17, %s1138_s17 }
  0x2e   : > { %p1141_p7 = pnand %p1139_p10, %p1077_p12  ;;  %p1148_p4 = por %p1147_p13, %p1146_p9 }
  0x30   : > { %p1142_p1 = pneg %p1141_p7 }
  0x32   : > { %p1149_p2 = pnand %p1148_p4, %p1142_p1 }
  0x34   : > { %1152 = shalt.err (!%p1149_p2)
}
  0x35   : > { %s1260_s23 = smov 128   ;;  %s1261_s27 = smov 8  }
  0x36   : > { %1002 = dma.hbm_to_vmem [thread:$0]  (!%p1344_p11), %s1485_s3, 8192, %s201_s8, [#allocation9], %s1260_s23, %s1260_s23, %s1261_s27  }
  0x37   : > { %s1375_s6 = sadd.s32 1, %s1253_s21   ;;  %s30_s9 = sadd.s32 1, %s1249_s20 }
  0x38   : > { %s27_s7 = ssub.s32 %s1253_s21, %s1375_s6  ;;  %p37_p6 = scmp.ne.s32.totalorder %s1249_s20, %s1245_s19 }
  0x39   : > { %p28_p4 = scmp.eq.s32.totalorder %s27_s7, 0  ;;  %p38_p12 = scmp.eq.s32.totalorder %s1253_s21, 0 }
  0x3a   : > { %p1014_p0 = scmp.lt.s32.totalorder %s1253_s21, 2  ;;  %p1496_p3 = scmp.eq.s32.totalorder %s1316_s22, 1 }
  0x3b   : > { %s1385_s10 = scalar_select %p28_p4, %s1249_s20, %s30_s9  }
  0x3c   : > { %p39_p5 = por %p38_p12, %p37_p6  ;;  %p1389_p10 = por %p1496_p3, %p37_p6 }
  0x3d   : > { %s217_s29 = sand.u32 1, %s1249_s20   ;;  %s891_s12 = sshll.u32 %s1253_s21, 7 }
  0x3e   : > { %s1497_s11 = scalar_select %p1389_p10, 1, 0 }
  0x3f   : > { %s890_s8 = sshll.u32 %s217_s29, 3  ;;  %s1398_s15 = scalar_lea.hbm %s1482_s0, %s891_s12 }
  0x40   : > { %s221_s16 = scalar_lea.vmem [#allocation2], %s890_s8  ;;  %p1400_p11 = pnand %p1014_p0, %p39_p5 }
  0x41   : > { %s228_s17 = sshll.u32 %s221_s16, 4  ;;  %s218_s27 = scalar_lea.sflag [#allocation3], %s217_s29  ;;  %s229_s17 = int_to_ptr.vmem [resolvable:$true] %s228_s17 }
  0x42   : > { %s1153_s28 = scalar_lea.hbm %s1398_s15, 128  ;;  %p1155_p1 = pneg %p1400_p11 }
  0x43   : > { %p1154_p7 = scmp.ne.s32.totalorder %s1398_s15, %s1153_s28  ;;  %s1158_s9 = scalar_lea.hbm %s1482_s0, 256 }
  0x44   : > { %p1159_p2 = scmp.lt.s32.totalorder %s1398_s15, %s1482_s0  ;;  %p1160_p4 = scmp.lt.s32.totalorder %s1158_s9, %s1153_s28 }
  0x45   : > { %p1156_p9 = pnand %p1155_p1, %p1154_p7 }
  0x46   : > { %p1161_p6 = por %p1160_p4, %p1159_p2 }
  0x47   : > { %p1157_p13 = pneg %p1156_p9 }
  0x49   : > { %p1162_p12 = pnand %p1161_p6, %p1157_p13 }
  0x4b   : > { %1165 = shalt.err (!%p1162_p12)
}
  0x4c   : > { %s1166_s13 = scalar_lea.vmem %s229_s17, 128  ;;  %s1262_s29 = smov [#allocation2]  }
  0x4d   : > { %p1167_p0 = scmp.ne.s32.totalorder %s229_s17, %s1166_s13  ;;  %s1171_s14 = sshll.u32 %s1262_s29, 4  ;;  %s1172_s14 = int_to_ptr.vmem [resolvable:$false] %s1171_s14 }
  0x4e   : > { %s1173_s16 = scalar_lea.vmem %s1172_s14, 256  ;;  %p1174_p7 = scmp.lt.s32.totalorder %s229_s17, %s1172_s14 }
  0x4f   : > { %p1169_p5 = pnand %p1167_p0, %p1155_p1  ;;  %p1175_p9 = scmp.lt.s32.totalorder %s1173_s16, %s1166_s13 }
  0x51   : > { %p1170_p3 = pneg %p1169_p5  ;;  %p1176_p10 = por %p1175_p9, %p1174_p7 }
  0x53   : > { %p1177_p8 = pnand %p1176_p10, %p1170_p3 }
  0x55   : > { %1180 = shalt.err (!%p1177_p8)
}
  0x56   : > { %1006 = dma.hbm_to_vmem [thread:$0]  (!%p1400_p11), %s1398_s15, 128, %s229_s17, %s218_s27  }
  0x57   : > { %p1499_p13 = scmp.ne.s32.totalorder %s1494_s26, 0 }
  0x58   : > { %s1421_s28 = sand.u32 (!%p1499_p13), 1, %s1245_s19   ;;  %p1500_p8 = scmp.ne.s32.totalorder (!%p1499_p13), %s1492_s24, 0 }
  0x59   : > { %237 = sbr.rel (%p1499_p13) target bundleno = 588 (0x24c), region = 40  ;;  %s893_s30 = sshll.u32 (!%p1499_p13), %s1421_s28, 3 }
  0x5a   : > { %s240_s7 = scalar_lea.sflag (!%p1499_p13), [#allocation3], %s1421_s28  ;;  %s1427_s9 = scalar_lea.vmem (!%p1499_p13), [#allocation2], %s893_s30 }
  0x5e   : > { %1224 = dma.done.wait (%p1500_p8), %s240_s7, 128  }
  0x5f   : > { %1226 = vsyncadd (%p1500_p8), %s240_s7, 4294967168  ;;  %p1501_p10 = scmp.eq.s32.totalorder %s1316_s22, 0 }
  0x61   : > { %1228 = dma.done.wait (%p1501_p10), [#allocation6], 8256   ;;  %p1502_p11 = pmov %p1501_p10 }
  0x62   : > { %p1503_p1 = pmov %p1501_p10 }
  0x63   : > { %1230 = vsyncadd (%p1502_p11), [#allocation6], 4294959040 }
  0x64   : > { %1232 = dma.done.wait (%p1503_p1), [#allocation9], 8192   ;;  %p1504_p2 = pmov %p1503_p1 }
  0x65   : > { %v1263_v0 = vmov 0.0   ;;  %v344_v1 = vld [vmem:[#allocation5 + $0x1e8] sm:$0xff]  ;;  %v346_v2 = vld [vmem:[#allocation5 + $0x1f8] sm:$0xff]  ;;  %v343_v3 = vld [vmem:[#allocation5 + $0x1e0] sm:$0xff]  ;;  %s904_s15 = sshll.u32 %s1316_s22, 7  ;;  %s281_s17 = scalar_lea.vmem [#allocation10], %s893_s30 }
  0x66   : > { %1234 = vsyncadd (%p1504_p2), [#allocation9], 4294959104  ;;  %433 = vmatprep.mubr.f32.mxu0 %v1263_v0  ;;  %504 = vmatprep.mubr.f32.mxu1 %v1263_v0  ;;  %v345_v4 = vld [vmem:[#allocation5 + $0x1f0] sm:$0xff]  ;;  %v340_v5 = vld [vmem:[#allocation5 + $0x1c8] sm:$0xff]  ;;  %s785_s23 = sshll.u32 %s281_s17, 4  ;;  %s783_s8 = scalar_lea.hbm %s1487_s5, %s904_s15  ;;  %s786_s23 = int_to_ptr.vmem [resolvable:$true] %s785_s23 }
  0x67   : > { %369 = vmatprep.subr.mxu0 %v344_v1  ;;  %440 = vmatprep.subr.mxu1 %v346_v2  ;;  %v342_v6 = vld [vmem:[#allocation5 + $0x1d8] sm:$0xff]  ;;  %v339_v7 = vld [vmem:[#allocation5 + $0x1c0] sm:$0xff]  ;;  %v341_v8 = vld [vmem:[#allocation5 + $0x1d0] sm:$0xff]  ;;  %s772_s13 = scalar_lea.sflag [#allocation4], %s1421_s28  ;;  %s1181_s29 = scalar_lea.vmem %s786_s23, 128 }
  0x68   : > { %370 = vmatpush1.msra.mxu0 %v343_v3  ;;  %441 = vmatpush1.msra.mxu1 %v345_v4  ;;  %v336_v9 = vld [vmem:[#allocation5 + $0x1a8] sm:$0xff]  ;;  %v338_v10 = vld [vmem:[#allocation5 + $0x1b8] sm:$0xff]  ;;  %v335_v11 = vld [vmem:[#allocation5 + $0x1a0] sm:$0xff]  ;;  %p1182_p4 = scmp.ne.s32.totalorder %s786_s23, %s1181_s29  ;;  %p1505_p6 = scmp.ne.s32.totalorder %s1497_s11, 0 }
  0x69   : > { %371 = vmatprep.subr.mxu0 %v340_v5  ;;  %442 = vmatprep.subr.mxu1 %v342_v6  ;;  %v337_v12 = vld [vmem:[#allocation5 + $0x1b0] sm:$0xff]  ;;  %v332_v13 = vld [vmem:[#allocation5 + $0x188] sm:$0xff]  ;;  %v334_v14 = vld [vmem:[#allocation5 + $0x198] sm:$0xff]  ;;  %s1264_s14 = smov [#allocation10]  }
  0x6a   : > { %372 = vmatpush1.msra.mxu0 %v339_v7  ;;  %443 = vmatpush1.msra.mxu1 %v341_v8  ;;  %v331_v15 = vld [vmem:[#allocation5 + $0x180] sm:$0xff]  ;;  %v333_v16 = vld [vmem:[#allocation5 + $0x190] sm:$0xff]  ;;  %v328_v17 = vld [vmem:[#allocation5 + $0x168] sm:$0xff]  ;;  %p1183_p12 = pnand %p1182_p4, %p1505_p6  ;;  %s1185_s22 = sshll.u32 %s1264_s14, 4  ;;  %s1186_s22 = int_to_ptr.vmem [resolvable:$false] %s1185_s22 }
  0x6b   : > { %373 = vmatprep.subr.mxu0 %v336_v9  ;;  %444 = vmatprep.subr.mxu1 %v338_v10  ;;  %v330_v18 = vld [vmem:[#allocation5 + $0x178] sm:$0xff]  ;;  %v327_v19 = vld [vmem:[#allocation5 + $0x160] sm:$0xff]  ;;  %v329_v20 = vld [vmem:[#allocation5 + $0x170] sm:$0xff]  ;;  %s1187_s16 = scalar_lea.vmem %s1186_s22, 256  ;;  %p1188_p5 = scmp.lt.s32.totalorder %s786_s23, %s1186_s22 }
  0x6c   : > { %374 = vmatpush1.msra.mxu0 %v335_v11  ;;  %445 = vmatpush1.msra.mxu1 %v337_v12  ;;  %v324_v21 = vld [vmem:[#allocation5 + $0x148] sm:$0xff]  ;;  %v326_v22 = vld [vmem:[#allocation5 + $0x158] sm:$0xff]  ;;  %v323_v23 = vld [vmem:[#allocation5 + $0x140] sm:$0xff]  ;;  %p1184_p0 = pneg %p1183_p12  ;;  %p1189_p3 = scmp.lt.s32.totalorder %s1187_s16, %s1181_s29 }
  0x6d   : > { %375 = vmatprep.subr.mxu0 %v332_v13  ;;  %446 = vmatprep.subr.mxu1 %v334_v14  ;;  %v325_v24 = vld [vmem:[#allocation5 + $0x150] sm:$0xff]  ;;  %v320_v25 = vld [vmem:[#allocation5 + $0x128] sm:$0xff]  ;;  %v322_v26 = vld [vmem:[#allocation5 + $0x138] sm:$0xff] }
  0x6e   : > { %376 = vmatpush1.msra.mxu0 %v331_v15  ;;  %447 = vmatpush1.msra.mxu1 %v333_v16  ;;  %v319_v27 = vld [vmem:[#allocation5 + $0x120] sm:$0xff]  ;;  %v321_v28 = vld [vmem:[#allocation5 + $0x130] sm:$0xff]  ;;  %v316_v29 = vld [vmem:[#allocation5 + $0x108] sm:$0xff]  ;;  %p1190_p7 = por %p1189_p3, %p1188_p5 }
  0x6f   : > { %377 = vmatprep.subr.mxu0 %v328_v17  ;;  %448 = vmatprep.subr.mxu1 %v330_v18  ;;  %v318_v30 = vld [vmem:[#allocation5 + $0x118] sm:$0xff]  ;;  %v315_v31 = vld [vmem:[#allocation5 + $0x100] sm:$0xff]  ;;  %v317_v32 = vld [vmem:[#allocation5 + $0x110] sm:$0xff] }
  0x70   : > { %378 = vmatpush1.msra.mxu0 %v327_v19  ;;  %449 = vmatpush1.msra.mxu1 %v329_v20  ;;  %v312_v33 = vld [vmem:[#allocation5 + $0xe8] sm:$0xff]  ;;  %v314_v34 = vld [vmem:[#allocation5 + $0xf8] sm:$0xff]  ;;  %v311_v35 = vld [vmem:[#allocation5 + $0xe0] sm:$0xff]  ;;  %p1191_p9 = pnand %p1190_p7, %p1184_p0 }
  0x71   : > { %379 = vmatprep.subr.mxu0 %v324_v21  ;;  %450 = vmatprep.subr.mxu1 %v326_v22  ;;  %v313_v36 = vld [vmem:[#allocation5 + $0xf0] sm:$0xff]  ;;  %v308_v37 = vld [vmem:[#allocation5 + $0xc8] sm:$0xff]  ;;  %v310_v38 = vld [vmem:[#allocation5 + $0xd8] sm:$0xff] }
  0x72   : > { %380 = vmatpush1.msra.mxu0 %v323_v23  ;;  %451 = vmatpush1.msra.mxu1 %v325_v24  ;;  %v307_v39 = vld [vmem:[#allocation5 + $0xc0] sm:$0xff]  ;;  %v309_v40 = vld [vmem:[#allocation5 + $0xd0] sm:$0xff]  ;;  %v304_v41 = vld [vmem:[#allocation5 + $0xa8] sm:$0xff] }
  0x73   : > { %381 = vmatprep.subr.mxu0 %v320_v25  ;;  %452 = vmatprep.subr.mxu1 %v322_v26  ;;  %v306_v42 = vld [vmem:[#allocation5 + $0xb8] sm:$0xff]  ;;  %v303_v43 = vld [vmem:[#allocation5 + $0xa0] sm:$0xff]  ;;  %v305_v44 = vld [vmem:[#allocation5 + $0xb0] sm:$0xff] }
  0x74   : > { %382 = vmatpush1.msra.mxu0 %v319_v27  ;;  %453 = vmatpush1.msra.mxu1 %v321_v28  ;;  %v300_v45 = vld [vmem:[#allocation5 + $0x88] sm:$0xff]  ;;  %v302_v46 = vld [vmem:[#allocation5 + $0x98] sm:$0xff]  ;;  %v299_v47 = vld [vmem:[#allocation5 + $0x80] sm:$0xff] }
  0x75   : > { %383 = vmatprep.subr.mxu0 %v316_v29  ;;  %454 = vmatprep.subr.mxu1 %v318_v30  ;;  %v301_v48 = vld [vmem:[#allocation5 + $0x90] sm:$0xff]  ;;  %v296_v49 = vld [vmem:[#allocation5 + $0x68] sm:$0xff]  ;;  %v298_v50 = vld [vmem:[#allocation5 + $0x78] sm:$0xff] }
  0x76   : > { %384 = vmatpush1.msra.mxu0 %v315_v31  ;;  %455 = vmatpush1.msra.mxu1 %v317_v32  ;;  %v295_v51 = vld [vmem:[#allocation5 + $0x60] sm:$0xff]  ;;  %v297_v52 = vld [vmem:[#allocation5 + $0x70] sm:$0xff]  ;;  %v292_v53 = vld [vmem:[#allocation5 + $0x48] sm:$0xff] }
  0x77   : > { %385 = vmatprep.subr.mxu0 %v312_v33  ;;  %456 = vmatprep.subr.mxu1 %v314_v34  ;;  %v294_v54 = vld [vmem:[#allocation5 + $0x58] sm:$0xff]  ;;  %v291_v55 = vld [vmem:[#allocation5 + $0x40] sm:$0xff]  ;;  %v293_v56 = vld [vmem:[#allocation5 + $0x50] sm:$0xff] }
  0x78   : > { %386 = vmatpush1.msra.mxu0 %v311_v35  ;;  %457 = vmatpush1.msra.mxu1 %v313_v36  ;;  %v288_v57 = vld [vmem:[#allocation5 + $0x28] sm:$0xff]  ;;  %v290_v58 = vld [vmem:[#allocation5 + $0x38] sm:$0xff]  ;;  %v287_v59 = vld [vmem:[#allocation5 + $0x20] sm:$0xff] }
  0x79   : > { %387 = vmatprep.subr.mxu0 %v308_v37  ;;  %458 = vmatprep.subr.mxu1 %v310_v38  ;;  %v289_v60 = vld [vmem:[#allocation5 + $0x30] sm:$0xff]  ;;  %v284_v61 = vld [vmem:[#allocation5 + $0x8] sm:$0xff]  ;;  %v286_v62 = vld [vmem:[#allocation5 + $0x18] sm:$0xff] }
  0x7a   : > { %388 = vmatpush1.msra.mxu0 %v307_v39  ;;  %459 = vmatpush1.msra.mxu1 %v309_v40  ;;  %v283_v63 = vld [vmem:[#allocation5] sm:$0xff]  ;;  %v285_v0 = vld [vmem:[#allocation5 + $0x10] sm:$0xff] }
  0x7b   : > { %389 = vmatprep.subr.mxu0 %v304_v41  ;;  %460 = vmatprep.subr.mxu1 %v306_v42  ;;  %v282_v1 = vld [vmem:[%s1427_s9] sm:$0xff]  ;;  %v587_v14 = vld [vmem:[#allocation8 + $0xe0] sm:$0xff] }
  0x7c   : > { %390 = vmatpush1.msra.mxu0 %v303_v43  ;;  %461 = vmatpush1.msra.mxu1 %v305_v44  ;;  %v590_v2 = vld [vmem:[#allocation8 + $0xf8] sm:$0xff]  ;;  %v589_v6 = vld [vmem:[#allocation8 + $0xf0] sm:$0xff]  ;;  %v588_v10 = vld [vmem:[#allocation8 + $0xe8] sm:$0xff] }
  0x7d   : > { %391 = vmatprep.subr.mxu0 %v300_v45  ;;  %462 = vmatprep.subr.mxu1 %v302_v46  ;;  %v622_v3 = vld [vmem:[#allocation8 + $0x1f8] sm:$0xff]  ;;  %v621_v7 = vld [vmem:[#allocation8 + $0x1f0] sm:$0xff]  ;;  %v620_v11 = vld [vmem:[#allocation8 + $0x1e8] sm:$0xff] }
  0x7e   : > { %392 = vmatpush1.msra.mxu0 %v299_v47  ;;  %463 = vmatpush1.msra.mxu1 %v301_v48  ;;  %v574_v4 = vld [vmem:[#allocation8 + $0x78] sm:$0xff]  ;;  %v573_v8 = vld [vmem:[#allocation8 + $0x70] sm:$0xff]  ;;  %v572_v12 = vld [vmem:[#allocation8 + $0x68] sm:$0xff] }
  0x7f   : > { %393 = vmatprep.subr.mxu0 %v296_v49  ;;  %464 = vmatprep.subr.mxu1 %v298_v50  ;;  %v606_v5 = vld [vmem:[#allocation8 + $0x178] sm:$0xff]  ;;  %v605_v9 = vld [vmem:[#allocation8 + $0x170] sm:$0xff]  ;;  %v604_v13 = vld [vmem:[#allocation8 + $0x168] sm:$0xff] }
  0x80   : > { %394 = vmatpush1.msra.mxu0 %v295_v51  ;;  %465 = vmatpush1.msra.mxu1 %v297_v52  ;;  %v619_v15 = vld [vmem:[#allocation8 + $0x1e0] sm:$0xff]  ;;  %v586_v18 = vld [vmem:[#allocation8 + $0xd8] sm:$0xff]  ;;  %v585_v22 = vld [vmem:[#allocation8 + $0xd0] sm:$0xff] }
  0x81   : > { %395 = vmatprep.subr.mxu0 %v292_v53  ;;  %466 = vmatprep.subr.mxu1 %v294_v54  ;;  %v571_v16 = vld [vmem:[#allocation8 + $0x60] sm:$0xff]  ;;  %v618_v19 = vld [vmem:[#allocation8 + $0x1d8] sm:$0xff]  ;;  %v617_v23 = vld [vmem:[#allocation8 + $0x1d0] sm:$0xff] }
  0x82   : > { %396 = vmatpush1.msra.mxu0 %v291_v55  ;;  %467 = vmatpush1.msra.mxu1 %v293_v56  ;;  %v603_v17 = vld [vmem:[#allocation8 + $0x160] sm:$0xff]  ;;  %v570_v20 = vld [vmem:[#allocation8 + $0x58] sm:$0xff]  ;;  %v569_v24 = vld [vmem:[#allocation8 + $0x50] sm:$0xff] }
  0x83   : > { %397 = vmatprep.subr.mxu0 %v288_v57  ;;  %468 = vmatprep.subr.mxu1 %v290_v58  ;;  %v602_v21 = vld [vmem:[#allocation8 + $0x158] sm:$0xff]  ;;  %v601_v25 = vld [vmem:[#allocation8 + $0x150] sm:$0xff]  ;;  %v584_v26 = vld [vmem:[#allocation8 + $0xc8] sm:$0xff] }
  0x84   : > { %398 = vmatpush1.msra.mxu0 %v287_v59  ;;  %469 = vmatpush1.msra.mxu1 %v289_v60  ;;  %v616_v27 = vld [vmem:[#allocation8 + $0x1c8] sm:$0xff]  ;;  %v583_v30 = vld [vmem:[#allocation8 + $0xc0] sm:$0xff]  ;;  %v582_v34 = vld [vmem:[#allocation8 + $0xb8] sm:$0xff] }
  0x85   : > { %399 = vmatprep.subr.mxu0 %v284_v61  ;;  %470 = vmatprep.subr.mxu1 %v286_v62  ;;  %v568_v28 = vld [vmem:[#allocation8 + $0x48] sm:$0xff]  ;;  %v615_v31 = vld [vmem:[#allocation8 + $0x1c0] sm:$0xff]  ;;  %v614_v35 = vld [vmem:[#allocation8 + $0x1b8] sm:$0xff] }
  0x86   : > { %400 = vmatpush1.msra.mxu0 %v283_v63  ;;  %471 = vmatpush1.msra.mxu1 %v285_v0  ;;  %v600_v29 = vld [vmem:[#allocation8 + $0x148] sm:$0xff]  ;;  %v567_v32 = vld [vmem:[#allocation8 + $0x40] sm:$0xff]  ;;  %v566_v36 = vld [vmem:[#allocation8 + $0x38] sm:$0xff] }
  0x87   : > { %434 = vmatmul.mubr.f32.vlgmr.msra.gmra.mxu0 %v282_v1  ;;  %505 = vmatmul.mubr.f32.vlgmr.msra.gmra.mxu1 %v282_v1  ;;  %v599_v33 = vld [vmem:[#allocation8 + $0x140] sm:$0xff]  ;;  %v598_v37 = vld [vmem:[#allocation8 + $0x138] sm:$0xff]  ;;  %v581_v38 = vld [vmem:[#allocation8 + $0xb0] sm:$0xff] }
  0x88   : > { %907 = vmatprep.subr.mxu0 %v590_v2  ;;  %942 = vmatprep.subr.mxu1 %v622_v3  ;;  %v613_v39 = vld [vmem:[#allocation8 + $0x1b0] sm:$0xff]  ;;  %v580_v42 = vld [vmem:[#allocation8 + $0xa8] sm:$0xff]  ;;  %v579_v46 = vld [vmem:[#allocation8 + $0xa0] sm:$0xff]  ;;  %v349_v2 = vlaneseq }
  0x89   : > { %908 = vmatpush3.msra.mxu0 %v574_v4  ;;  %943 = vmatpush3.msra.mxu1 %v606_v5  ;;  %v565_v40 = vld [vmem:[#allocation8 + $0x30] sm:$0xff]  ;;  %v612_v43 = vld [vmem:[#allocation8 + $0x1a8] sm:$0xff]  ;;  %v611_v47 = vld [vmem:[#allocation8 + $0x1a0] sm:$0xff] }
  0x8a   : > { %909 = vmatprep.subr.mxu0 %v589_v6  ;;  %944 = vmatprep.subr.mxu1 %v621_v7  ;;  %v597_v41 = vld [vmem:[#allocation8 + $0x130] sm:$0xff]  ;;  %v564_v44 = vld [vmem:[#allocation8 + $0x28] sm:$0xff]  ;;  %v563_v48 = vld [vmem:[#allocation8 + $0x20] sm:$0xff]  ;;  %v350_v3 = vshrl.u32 %v349_v2, 7 }
  0x8b   : > { %910 = vmatpush3.msra.mxu0 %v573_v8  ;;  %945 = vmatpush3.msra.mxu1 %v605_v9  ;;  %v596_v45 = vld [vmem:[#allocation8 + $0x128] sm:$0xff]  ;;  %v595_v49 = vld [vmem:[#allocation8 + $0x120] sm:$0xff]  ;;  %v578_v50 = vld [vmem:[#allocation8 + $0x98] sm:$0xff] }
  0x8c   : > { %911 = vmatprep.subr.mxu0 %v588_v10  ;;  %946 = vmatprep.subr.mxu1 %v620_v11  ;;  %v610_v51 = vld [vmem:[#allocation8 + $0x198] sm:$0xff]  ;;  %v577_v54 = vld [vmem:[#allocation8 + $0x90] sm:$0xff]  ;;  %v576_v58 = vld [vmem:[#allocation8 + $0x88] sm:$0xff]  ;;  %v351_v4 = vsub.s32 0, %v350_v3  ;;  %v359_v5 = vsub.s32 2, %v350_v3  ;;  %v355_v7 = vsub.s32 1, %v350_v3 }
  0x8d   : > { %912 = vmatpush3.msra.mxu0 %v572_v12  ;;  %947 = vmatpush3.msra.mxu1 %v604_v13  ;;  %v562_v52 = vld [vmem:[#allocation8 + $0x18] sm:$0xff]  ;;  %v609_v55 = vld [vmem:[#allocation8 + $0x190] sm:$0xff]  ;;  %v608_v59 = vld [vmem:[#allocation8 + $0x188] sm:$0xff]  ;;  %v363_v8 = vsub.s32 3, %v350_v3 }
  0x8e   : > { %913 = vmatprep.subr.mxu0 %v587_v14  ;;  %948 = vmatprep.subr.mxu1 %v619_v15  ;;  %v594_v53 = vld [vmem:[#allocation8 + $0x118] sm:$0xff]  ;;  %v561_v56 = vld [vmem:[#allocation8 + $0x10] sm:$0xff]  ;;  %v560_v60 = vld [vmem:[#allocation8 + $0x8] sm:$0xff] }
  0x8f   : > { %914 = vmatpush3.msra.mxu0 %v571_v16  ;;  %949 = vmatpush3.msra.mxu1 %v603_v17  ;;  %v593_v57 = vld [vmem:[#allocation8 + $0x110] sm:$0xff]  ;;  %v592_v61 = vld [vmem:[#allocation8 + $0x108] sm:$0xff]  ;;  %v575_v62 = vld [vmem:[#allocation8 + $0x80] sm:$0xff] }
  0x90   : > { %915 = vmatprep.subr.mxu0 %v586_v18  ;;  %950 = vmatprep.subr.mxu1 %v618_v19  ;;  %v607_v63 = vld [vmem:[#allocation8 + $0x180] sm:$0xff]  ;;  %v347_v6 = vld [vmem:[#allocation7] sm:$0xf] }
  0x91   : > { %916 = vmatpush3.msra.mxu0 %v570_v20  ;;  %951 = vmatpush3.msra.mxu1 %v602_v21  ;;  %v559_v0 = vld [vmem:[#allocation8] sm:$0xff]  ;;  %v352_v9 = vrot.slane %v347_v6, %v351_v4  ;;  %v360_v10 = vrot.slane %v347_v6, %v359_v5  ;;  %v356_v13 = vrot.slane %v347_v6, %v355_v7 }
  0x92   : > { %917 = vmatprep.subr.mxu0 %v585_v22  ;;  %952 = vmatprep.subr.mxu1 %v617_v23  ;;  %v591_v1 = vld [vmem:[#allocation8 + $0x100] sm:$0xff]  ;;  %v364_v14 = vrot.slane %v347_v6, %v363_v8 }
  0x93   : > { %918 = vmatpush3.msra.mxu0 %v569_v24  ;;  %953 = vmatpush3.msra.mxu1 %v601_v25 }
  0x94   : > { %919 = vmatprep.subr.mxu0 %v584_v26  ;;  %954 = vmatprep.subr.mxu1 %v616_v27 }
  0x95   : > { %920 = vmatpush3.msra.mxu0 %v568_v28  ;;  %955 = vmatpush3.msra.mxu1 %v600_v29 }
  0x96   : > { %921 = vmatprep.subr.mxu0 %v583_v30  ;;  %956 = vmatprep.subr.mxu1 %v615_v31 }
  0x97   : > { %922 = vmatpush3.msra.mxu0 %v567_v32  ;;  %957 = vmatpush3.msra.mxu1 %v599_v33 }
  0x98   : > { %923 = vmatprep.subr.mxu0 %v582_v34  ;;  %958 = vmatprep.subr.mxu1 %v614_v35 }
  0x99   : > { %924 = vmatpush3.msra.mxu0 %v566_v36  ;;  %959 = vmatpush3.msra.mxu1 %v598_v37 }
  0x9a   : > { %925 = vmatprep.subr.mxu0 %v581_v38  ;;  %960 = vmatprep.subr.mxu1 %v613_v39 }
  0x9b   : > { %926 = vmatpush3.msra.mxu0 %v565_v40  ;;  %961 = vmatpush3.msra.mxu1 %v597_v41 }
  0x9c   : > { %927 = vmatprep.subr.mxu0 %v580_v42  ;;  %962 = vmatprep.subr.mxu1 %v612_v43 }
  0x9d   : > { %928 = vmatpush3.msra.mxu0 %v564_v44  ;;  %963 = vmatpush3.msra.mxu1 %v596_v45 }
  0x9e   : > { %929 = vmatprep.subr.mxu0 %v579_v46  ;;  %964 = vmatprep.subr.mxu1 %v611_v47 }
  0x9f   : > { %930 = vmatpush3.msra.mxu0 %v563_v48  ;;  %965 = vmatpush3.msra.mxu1 %v595_v49 }
  0xa0   : > { %931 = vmatprep.subr.mxu0 %v578_v50  ;;  %966 = vmatprep.subr.mxu1 %v610_v51 }
  0xa1   : > { %932 = vmatpush3.msra.mxu0 %v562_v52  ;;  %967 = vmatpush3.msra.mxu1 %v594_v53 }
  0xa2   : > { %933 = vmatprep.subr.mxu0 %v577_v54  ;;  %968 = vmatprep.subr.mxu1 %v609_v55 }
  0xa3   : > { %934 = vmatpush3.msra.mxu0 %v561_v56  ;;  %969 = vmatpush3.msra.mxu1 %v593_v57 }
  0xa4   : > { %935 = vmatprep.subr.mxu0 %v576_v58  ;;  %970 = vmatprep.subr.mxu1 %v608_v59 }
  0xa5   : > { %936 = vmatpush3.msra.mxu0 %v560_v60  ;;  %971 = vmatpush3.msra.mxu1 %v592_v61 }
  0xa6   : > { %937 = vmatprep.subr.mxu0 %v575_v62  ;;  %972 = vmatprep.subr.mxu1 %v607_v63  ;;  %v902_v63 = vld [vmem:[%s1486_s4] ss:$0 sm:$0xff] }
  0xa7   : > { %938 = vmatpush3.msra.mxu0 %v559_v0  ;;  %973 = vmatpush3.msra.mxu1 %v591_v1 }
 0x147   : > { %v435_v11 = vpop.f32.mrf.mxu0  ;;  %v506_v12 = vpop.f32.mrf.mxu1 }
 0x148   : > { %v436_v15 = vadd.f32 %v435_v11, %v352_v9  ;;  %v507_v16 = vadd.f32 %v506_v12, %v360_v10 }
 0x149   : > { %v437_v17 = vpop.f32.mrf.mxu0  ;;  %v508_v18 = vpop.f32.mrf.mxu1 }
 0x14a   : > { %v515_v19 = vmul.f32 0.071354814, %v436_v15  ;;  %v519_v20 = vmul.f32 %v436_v15, %v436_v15  ;;  %v513_v21 = vmul.f32 1.5957692, %v507_v16  ;;  %v517_v22 = vmul.f32 0.071354814, %v507_v16 }
 0x14b   : > { %v521_v23 = vmul.f32 %v507_v16, %v507_v16  ;;  %v438_v24 = vadd.f32 %v437_v17, %v356_v13  ;;  %v509_v25 = vadd.f32 %v508_v18, %v364_v14  ;;  %v511_v26 = vmul.f32 1.5957692, %v436_v15 }
 0x14c   : > { %v523_v27 = vmul.f32 %v519_v20, %v515_v19 }
 0x14d   : > { %v525_v28 = vmul.f32 %v521_v23, %v517_v22  ;;  %v516_v29 = vmul.f32 0.071354814, %v438_v24  ;;  %v520_v30 = vmul.f32 %v438_v24, %v438_v24  ;;  %v518_v32 = vmul.f32 0.071354814, %v509_v25 }
 0x14e   : > { %v527_v31 = vadd.f32 %v523_v27, %v511_v26  ;;  %v522_v33 = vmul.f32 %v509_v25, %v509_v25  ;;  %v512_v35 = vmul.f32 1.5957692, %v438_v24  ;;  %v514_v38 = vmul.f32 1.5957692, %v509_v25 }
 0x14f   : > { %v529_v34 = vadd.f32 %v525_v28, %v513_v21  ;;  %v524_v36 = vmul.f32 %v520_v30, %v516_v29 }
 0x150   : > { %v898_v37 = vmul.f32 -1.442695, %v527_v31  ;;  %v526_v39 = vmul.f32 %v522_v33, %v518_v32 }
 0x151   : > { %v900_v40 = vmul.f32 -1.442695, %v529_v34  ;;  %v528_v41 = vadd.f32 %v524_v36, %v512_v35 }
 0x152   : > { %1059 = vpow2.f32 %v898_v37  ;;  %v530_v42 = vadd.f32 %v526_v39, %v514_v38 }
 0x153   : > { %1061 = vpow2.f32 %v900_v40  ;;  %v899_v43 = vmul.f32 -1.442695, %v528_v41 }
 0x154   : > { %v901_v44 = vmul.f32 -1.442695, %v530_v42 }
 0x155   : > { %1063 = vpow2.f32 %v899_v43 }
 0x156   : > { %1065 = vpow2.f32 %v901_v44 }
 0x15f   : > { %v1060_v45 = vpop.eup %1059 }
 0x160   : > { %v1062_v46 = vpop.eup %1061  ;;  %v543_v47 = vadd.f32 1.0, %v1060_v45 }
 0x161   : > { %v545_v48 = vadd.f32 1.0, %v1062_v46 }
 0x162   : > { %v1064_v49 = vpop.eup %1063  ;;  %1067 = vrcp.f32 %v543_v47 }
 0x163   : > { %v1066_v50 = vpop.eup %1065  ;;  %v544_v51 = vadd.f32 1.0, %v1064_v49  ;;  %1069 = vrcp.f32 %v545_v48 }
 0x164   : > { %v546_v52 = vadd.f32 1.0, %v1066_v50 }
 0x165   : > { %1071 = vrcp.f32 %v544_v51 }
 0x166   : > { %1073 = vrcp.f32 %v546_v52 }
 0x16f   : > { %v1068_v53 = vpop.eup %1067 }
 0x170   : > { %v1070_v54 = vpop.eup %1069  ;;  %v555_v59 = vmul.f32 %v1068_v53, %v436_v15 }
 0x171   : > { %v557_v60 = vmul.f32 %v1070_v54, %v507_v16 }
 0x172   : > { %v1072_v55 = vpop.eup %1071 }
 0x173   : > { %v1074_v56 = vpop.eup %1073  ;;  %v556_v57 = vmul.f32 %v1072_v55, %v438_v24 }
 0x174   : > { %v558_v58 = vmul.f32 %v1074_v56, %v509_v25 }
 0x175   : > { %694 = vmatprep.mubr.f32.mxu0 %v556_v57 }
 0x176   : > { %764 = vmatprep.mubr.f32.mxu1 %v558_v58  ;;  %695 = vmatmul.mubr.f32.vlgmr.msra.gmra.mxu0 %v555_v59 }
 0x177   : > { %765 = vmatmul.mubr.f32.vlgmr.msra.gmra.mxu1 %v557_v60 }
 0x236   : > { %v939_v61 = vpop.f32.mrf.mxu0 }
 0x237   : > { %v974_v62 = vpop.f32.mrf.mxu1 }
 0x238   : > { %v940_v0 = vpop.f32.mrf.mxu0 }
 0x239   : > { %v941_v1 = vadd.f32 %v940_v0, %v939_v61  ;;  %v975_v2 = vpop.f32.mrf.mxu1 }
 0x23a   : > { %v976_v4 = vadd.f32 %v975_v2, %v974_v62 }
 0x23b   : > { %v697_v3 = vadd.f32 %v941_v1, %v902_v63 }
 0x23d   : > { %v767_v5 = vadd.f32 %v976_v4, %v697_v3 }
 0x23f   : > { %770 = vst [vmem:[%s281_s17] sm:$0xff] %v767_v5 }
 0x240   : > { %1194 = shalt.err (!%p1191_p9)
}
 0x241   : > { %s1195_s30 = scalar_lea.hbm %s783_s8, 128  ;;  %s1199_s9 = scalar_lea.hbm %s1487_s5, 256 }
 0x242   : > { %p1196_p13 = scmp.ne.s32.totalorder %s783_s8, %s1195_s30  ;;  %p1200_p11 = scmp.lt.s32.totalorder %s783_s8, %s1487_s5 }
 0x243   : > { %p1201_p1 = scmp.lt.s32.totalorder %s1199_s9, %s1195_s30 }
 0x244   : > { %p1197_p8 = pnand %p1196_p13, %p1505_p6 }
 0x245   : > { %p1202_p2 = por %p1201_p1, %p1200_p11 }
 0x246   : > { %p1198_p10 = pneg %p1197_p8 }
 0x248   : > { %p1203_p4 = pnand %p1202_p2, %p1198_p10 }
 0x24a   : > { %1206 = shalt.err (!%p1203_p4)
}
 0x24b   : > { %991 = dma.vmem_to_hbm [thread:$0]  (%p1505_p6), %s786_s23, 128, %s783_s8, %s772_s13  }
 0x24c PF: > { %s797_s15 = sand.u32 1, %s1241_s18   ;;  %p1506_p12 = scmp.ne.s32.totalorder %s1493_s25, 0 }
 0x24d   : > { %p1507_p0 = scmp.ge.s32.totalorder %s1253_s21, 2  ;;  %s798_s17 = scalar_lea.sflag [#allocation4], %s797_s15 }
 0x24f   : > { %p1008_p5 = pnand %p1507_p0, %p1506_p12 }
 0x251   : > { %p1009_p3 = pneg %p1008_p5 }
 0x253   : > { %1236 = dma.done.wait (%p1009_p3), %s798_s17, 128  }
 0x254   : > { %1238 = vsyncadd (%p1009_p3), %s798_s17, 4294967168  ;;  %p20_p7 = scmp.ge.s32.totalorder %s1375_s6, 4   ;;  %s1508_s18 = smov %s1245_s19 }
 0x255   : > { %s1509_s19 = smov %s1249_s20  ;;  %s1510_s20 = smov %s1385_s10 }
 0x256   : > { %s1511_s21 = smov %s1375_s6  ;;  %22 = sbr.rel (!%p20_p7) target bundleno = 7 (0x7), region = 97 }
 0x25b   :  { %803 = vsyncpa [#allocation3], 1 }
 0x25c   :  { %805 = vsyncpa [#allocation3 + $0x1], 1 }
 0x25d   :  { %806 = vsyncpa [#allocation6], 1 }
 0x25e   :  { %807 = vsyncpa [#allocation9], 1 }
 0x25f   :  { %808 = vsyncpa [#allocation4], 1 }
 0x260   :  { %810 = vsyncpa [#allocation4 + $0x1], 1 }

</bundles_post_ra>
